<compile_context>
chip_gen: v6e
topology: v6e:2x2x1
jax: 0.10.0
libtpu: 0.0.40
codegen_flags: <defaults>
</compile_context>

<pallas_src>
import jax
import jax.numpy as jnp
from jax.experimental import pallas as pl
from jax.experimental.pallas import tpu as pltpu


def _mlp_kernel(x_ref, w1_ref, b1_ref, w2_ref, b2_ref, o_ref):
    # First linear: [tm, Cin] @ [Cin, E] ; accumulate in f32 on the MXU.
    x = x_ref[...]
    h = jnp.dot(x.astype(w1_ref.dtype), w1_ref[...],
                preferred_element_type=jnp.float32)
    h = h + b1_ref[...].astype(jnp.float32)          # one broadcast per tile
    # SiLU in f32 (sigmoid on the EUP, multiply on the VPU).
    h = h * jax.nn.sigmoid(h)
    # Second linear: cast activation to the weight dtype only at the MXU
    # boundary (bf16 weights -> bf16 MXU path, f32 accumulation).
    y = jnp.dot(h.astype(w2_ref.dtype), w2_ref[...],
                preferred_element_type=jnp.float32)
    y = y + b2_ref[...].astype(jnp.float32)
    o_ref[...] = y.astype(o_ref.dtype)


def _round_up(x, m):
    return ((x + m - 1) // m) * m


def g_timestep_embedding(x, w1, b1, w2, b2, *, block_m=256):
    """x: [B, model_channle]; w1: [model_channle, E] (pre-transposed, i.e.
    PyTorch weight.T); b1: [E]; w2: [E, E] (weight.T); b2: [E].
    Returns [B, E] in x.dtype."""
    B, cin = x.shape
    E = w1.shape[1]
    out_dtype = x.dtype

    # Lane-dense padding of feature dims (zeros do not change the math).
    cin_p = _round_up(cin, 128)
    e_p = _round_up(E, 128)

    # Batch tile: fill the MXU rows when B is large, but never exceed B
    # (rounded to the 8-sublane granule) for tiny batches.
    tm = min(block_m, _round_up(B, 8))
    b_p = _round_up(B, tm)
    grid_m = b_p // tm

    x_p = jnp.pad(x, ((0, b_p - B), (0, cin_p - cin)))
    w1_p = jnp.pad(w1, ((0, cin_p - cin), (0, e_p - E)))
    w2_p = jnp.pad(w2, ((0, e_p - E), (0, e_p - E)))
    b1_p = jnp.pad(b1, (0, e_p - E)).reshape(1, e_p)
    b2_p = jnp.pad(b2, (0, e_p - E)).reshape(1, e_p)

    itemsize = lambda a: a.size * a.dtype.itemsize
    cost = pl.CostEstimate(
        flops=2 * b_p * (cin_p * e_p + e_p * e_p),
        transcendentals=b_p * e_p,  # sigmoid
        bytes_accessed=(itemsize(x_p) + itemsize(w1_p) + itemsize(w2_p)
                        + itemsize(b1_p) + itemsize(b2_p)
                        + b_p * e_p * jnp.dtype(out_dtype).itemsize),
    )

    out = pl.pallas_call(
        _mlp_kernel,
        out_shape=jax.ShapeDtypeStruct((b_p, e_p), out_dtype),
        grid=(grid_m,),
        in_specs=[
            pl.BlockSpec((tm, cin_p), lambda i: (i, 0)),     # streamed x tile
            pl.BlockSpec((cin_p, e_p), lambda i: (0, 0)),    # resident W1
            pl.BlockSpec((1, e_p), lambda i: (0, 0)),        # resident b1
            pl.BlockSpec((e_p, e_p), lambda i: (0, 0)),      # resident W2
            pl.BlockSpec((1, e_p), lambda i: (0, 0)),        # resident b2
        ],
        out_specs=pl.BlockSpec((tm, e_p), lambda i: (i, 0)),
        compiler_params=pltpu.CompilerParams(
            # Batch tiles are independent -> shard across v7x's two TCs.
            dimension_semantics=("parallel",),
            # NOTE: for very large E (e.g. f32 W2 at E>=2048) raise
            # vmem_limit_bytes here and/or pass bf16 weights.
        ),
        cost_estimate=cost,
    )(x_p, w1_p, b1_p, w2_p, b2_p)

    return out[:B, :E]


def _reference(x, w1, b1, w2, b2):
    h = x @ w1 + b1
    h = h * jax.nn.sigmoid(h)
    return h @ w2 + b2


if __name__ == "__main__":
    # Small shapes: batch=8, model_channle=32, embedding_dim=64
    B, MODEL_CH, EMB = 8, 32, 64
    key = jax.random.PRNGKey(0)
    kx, k1, kb1, k2, kb2 = jax.random.split(key, 5)

    x = jax.random.normal(kx, (B, MODEL_CH), dtype=jnp.float32)

    # PyTorch Linear: weight [out, in], bias [out]; stored here pre-transposed
    # as [in, out] for the kernel.
    w1 = jax.random.normal(k1, (MODEL_CH, EMB), dtype=jnp.float32) * 0.05
    b1 = jax.random.normal(kb1, (EMB,), dtype=jnp.float32) * 0.05
    w2 = jax.random.normal(k2, (EMB, EMB), dtype=jnp.float32) * 0.05
    b2 = jax.random.normal(kb2, (EMB,), dtype=jnp.float32) * 0.05

    y = g_timestep_embedding(x, w1, b1, w2, b2)
    jax.block_until_ready(y)

    y_ref = _reference(x, w1, b1, w2, b2)
    assert y.shape == (B, EMB)
    assert jnp.allclose(y, y_ref, atol=1e-5, rtol=1e-5)

    # Second check: multi-tile batch path (grid > 1, padded B) stays correct.
    B2 = 300
    x2 = jax.random.normal(jax.random.PRNGKey(1), (B2, MODEL_CH),
                           dtype=jnp.float32)
    y2 = g_timestep_embedding(x2, w1, b1, w2, b2, block_m=128)
    jax.block_until_ready(y2)
    y2_ref = _reference(x2, w1, b1, w2, b2)
    assert y2.shape == (B2, EMB)
    assert jnp.allclose(y2, y2_ref, atol=1e-5, rtol=1e-5)

    print("KERNEL_OK")
</pallas_src>

<mosaic_0001>
module attributes {stable_mosaic.version = 11 : i64} {
  func.func @_mlp_kernel(%arg0: i32, %arg1: memref<8x128xf32, #tpu.memory_space<vmem>>, %arg2: memref<128x128xf32, #tpu.memory_space<vmem>>, %arg3: memref<1x128xf32, #tpu.memory_space<vmem>>, %arg4: memref<128x128xf32, #tpu.memory_space<vmem>>, %arg5: memref<1x128xf32, #tpu.memory_space<vmem>>, %arg6: memref<8x128xf32, #tpu.memory_space<vmem>>) attributes {dimension_semantics = [#tpu.dimension_semantics<parallel>], iteration_bounds = array<i64: 1>, scalar_prefetch = 0 : i64, scratch_operands = 0 : i64, tpu.core_type = #tpu.core_type<tc>, window_params = [{transform_indices = @transform_0, window_bounds = array<i64: 8, 128>}, {pipeline_mode = #tpu.pipeline_mode<synchronous>, transform_indices = @transform_1, window_bounds = array<i64: 128, 128>}, {pipeline_mode = #tpu.pipeline_mode<synchronous>, transform_indices = @transform_2, window_bounds = array<i64: 1, 128>}, {pipeline_mode = #tpu.pipeline_mode<synchronous>, transform_indices = @transform_3, window_bounds = array<i64: 128, 128>}, {pipeline_mode = #tpu.pipeline_mode<synchronous>, transform_indices = @transform_4, window_bounds = array<i64: 1, 128>}, {transform_indices = @transform_5, window_bounds = array<i64: 8, 128>}]} {
    %c0 = arith.constant 0 : index
    %c0_0 = arith.constant 0 : index
    %0 = vector.load %arg1[%c0, %c0_0] : memref<8x128xf32, #tpu.memory_space<vmem>>, vector<8x128xf32>
    %c0_1 = arith.constant 0 : index
    %c0_2 = arith.constant 0 : index
    %1 = vector.load %arg2[%c0_1, %c0_2] : memref<128x128xf32, #tpu.memory_space<vmem>>, vector<128x128xf32>
    %cst = arith.constant dense<0.000000e+00> : vector<8x128xf32>
    %2 = tpu.matmul %0, %1, %cst {dimension_numbers = #tpu.dot_dimension_numbers<[1], [0], [0], [1], [0, 0, 1, 1], [], []>} : vector<8x128xf32>, vector<128x128xf32>, vector<8x128xf32> -> vector<8x128xf32>
    %c0_3 = arith.constant 0 : index
    %c0_4 = arith.constant 0 : index
    %3 = vector.load %arg3[%c0_3, %c0_4] : memref<1x128xf32, #tpu.memory_space<vmem>>, vector<1x128xf32>
    %4 = vector.broadcast %3 : vector<1x128xf32> to vector<8x128xf32>
    %5 = arith.addf %2, %4 : vector<8x128xf32>
    %6 = arith.negf %5 : vector<8x128xf32>
    %7 = math.exp %6 : vector<8x128xf32>
    %cst_5 = arith.constant 1.000000e+00 : f32
    %8 = vector.broadcast %cst_5 : f32 to vector<8x128xf32>
    %9 = arith.addf %8, %7 : vector<8x128xf32>
    %10 = arith.divf %8, %9 : vector<8x128xf32>
    %11 = arith.mulf %5, %10 : vector<8x128xf32>
    %c0_6 = arith.constant 0 : index
    %c0_7 = arith.constant 0 : index
    %12 = vector.load %arg4[%c0_6, %c0_7] : memref<128x128xf32, #tpu.memory_space<vmem>>, vector<128x128xf32>
    %cst_8 = arith.constant dense<0.000000e+00> : vector<8x128xf32>
    %13 = tpu.matmul %11, %12, %cst_8 {dimension_numbers = #tpu.dot_dimension_numbers<[1], [0], [0], [1], [0, 0, 1, 1], [], []>} : vector<8x128xf32>, vector<128x128xf32>, vector<8x128xf32> -> vector<8x128xf32>
    %c0_9 = arith.constant 0 : index
    %c0_10 = arith.constant 0 : index
    %14 = vector.load %arg5[%c0_9, %c0_10] : memref<1x128xf32, #tpu.memory_space<vmem>>, vector<1x128xf32>
    %15 = vector.broadcast %14 : vector<1x128xf32> to vector<8x128xf32>
    %16 = arith.addf %13, %15 : vector<8x128xf32>
    %c0_11 = arith.constant 0 : index
    %c0_12 = arith.constant 0 : index
    %17 = vector.load %arg6[%c0_11, %c0_12] : memref<8x128xf32, #tpu.memory_space<vmem>>, vector<8x128xf32>
    tpu.vector_store %arg6[%c0_11, %c0_12], %16 {strides = array<i32>} : memref<8x128xf32, #tpu.memory_space<vmem>>, vector<8x128xf32>,
    return
  }
  func.func @transform_0(%arg0: i32) -> (i32, i32) {
    %c0_i32 = arith.constant 0 : i32
    %c0_i32_0 = arith.constant 0 : i32
    return %arg0, %c0_i32 : i32, i32
  }
  func.func @transform_1(%arg0: i32) -> (i32, i32) {
    %c0_i32 = arith.constant 0 : i32
    %c0_i32_0 = arith.constant 0 : i32
    %c0_i32_1 = arith.constant 0 : i32
    return %c0_i32, %c0_i32_0 : i32, i32
  }
  func.func @transform_2(%arg0: i32) -> (i32, i32) {
    %c0_i32 = arith.constant 0 : i32
    %c0_i32_0 = arith.constant 0 : i32
    %c0_i32_1 = arith.constant 0 : i32
    return %c0_i32, %c0_i32_0 : i32, i32
  }
  func.func @transform_3(%arg0: i32) -> (i32, i32) {
    %c0_i32 = arith.constant 0 : i32
    %c0_i32_0 = arith.constant 0 : i32
    %c0_i32_1 = arith.constant 0 : i32
    return %c0_i32, %c0_i32_0 : i32, i32
  }
  func.func @transform_4(%arg0: i32) -> (i32, i32) {
    %c0_i32 = arith.constant 0 : i32
    %c0_i32_0 = arith.constant 0 : i32
    %c0_i32_1 = arith.constant 0 : i32
    return %c0_i32, %c0_i32_0 : i32, i32
  }
  func.func @transform_5(%arg0: i32) -> (i32, i32) {
    %c0_i32 = arith.constant 0 : i32
    %c0_i32_0 = arith.constant 0 : i32
    return %arg0, %c0_i32 : i32, i32
  }
}

</mosaic_0001>

<bundles_post_ra>
// kernel: tpu_custom_call.1
= control target key start
LH: loop header
LB: loop body
LE: loop exit
PB: predicated region body
PF: predicated region fallthrough
CT: control target
= control target key end

     0   :  { %10 = vsyncpa [#allocation3], 0  ;;  %s566_s0 = inlined_call_operand.hbm [shape: f32[8,128], index: 0, kind: input, shape index: {}]   ;;  %s567_s1 = inlined_call_operand.hbm [shape: f32[128,128], index: 1, kind: input, shape index: {}]   ;;  %s568_s2 = inlined_call_operand.vmem [shape: f32[1,128], index: 2, kind: input, shape index: {}]   ;;  %s569_s3 = inlined_call_operand.hbm [shape: f32[128,128], index: 3, kind: input, shape index: {}]   ;;  %s570_s4 = inlined_call_operand.vmem [shape: f32[1,128], index: 4, kind: input, shape index: {}]   ;;  %s571_s5 = inlined_call_operand.hbm [shape: f32[8,128], index: 5, kind: output, shape index: {}]  }
   0x1   :  { %11 = vsyncpa [#allocation6], 0 }
   0x2   :  { %12 = vsyncpa [#allocation4], 0  ;;  %s476_s18 = smov [#allocation5]  }
   0x3   :  { %s28_s19 = sshll.u32 %s476_s18, 4  ;;  %s29_s19 = int_to_ptr.vmem [resolvable:$true] %s28_s19 }
   0x4   :  { %s398_s20 = scalar_lea.vmem %s29_s19, 2048  ;;  %p403_p1 = scmp.lt.s32.totalorder %s29_s19, %s29_s19 }
   0x5   :  { %p399_p0 = scmp.ne.s32.totalorder %s29_s19, %s398_s20  ;;  %p404_p2 = scmp.lt.s32.totalorder %s398_s20, %s398_s20 }
   0x7   :  { %p405_p3 = por %p404_p2, %p403_p1 }
   0x9   :  { %p406_p4 = pnand %p405_p3, %p399_p0 }
   0xb   :  { %409 = shalt.err (!%p406_p4)
}
   0xc   :  { %s477_s21 = smov 128   ;;  %s478_s22 = smov 8  }
   0xd   :  { %34 = dma.hbm_to_vmem [thread:$0]  %s567_s1, 2048, %s29_s19, [#allocation6], %s477_s21, %s477_s21, %s478_s22  }
   0xe   :  { %s479_s25 = smov [#allocation2]   ;;  %s480_s27 = smov [#allocation7]  }
   0xf   :  { %s19_s26 = sshll.u32 %s479_s25, 4  ;;  %s42_s28 = sshll.u32 %s480_s27, 4  ;;  %s20_s26 = int_to_ptr.vmem [resolvable:$true] %s19_s26  ;;  %s43_s28 = int_to_ptr.vmem [resolvable:$true] %s42_s28 }
  0x10   :  { %s418_s29 = scalar_lea.vmem %s20_s26, 128  ;;  %p423_p6 = scmp.lt.s32.totalorder %s20_s26, %s20_s26 }
  0x11   :  { %p419_p5 = scmp.ne.s32.totalorder %s20_s26, %s418_s29  ;;  %p424_p7 = scmp.lt.s32.totalorder %s418_s29, %s418_s29 }
  0x13   :  { %p425_p8 = por %p424_p7, %p423_p6 }
  0x15   :  { %p426_p9 = pnand %p425_p8, %p419_p5 }
  0x17   :  { %429 = shalt.err (!%p426_p9)
}
  0x18   :  { %22 = dma.hbm_to_vmem [thread:$0]  %s566_s0, 128, %s20_s26, [#allocation3]  }
  0x19   :  { %s438_s7 = scalar_lea.vmem %s43_s28, 2048  ;;  %p443_p11 = scmp.lt.s32.totalorder %s43_s28, %s43_s28 }
  0x1a   :  { %p439_p10 = scmp.ne.s32.totalorder %s43_s28, %s438_s7  ;;  %p444_p12 = scmp.lt.s32.totalorder %s438_s7, %s438_s7 }
  0x1c   :  { %p445_p13 = por %p444_p12, %p443_p11 }
  0x1e   :  { %p446_p0 = pnand %p445_p13, %p439_p10 }
  0x20   :  { %449 = shalt.err (!%p446_p0)
}
  0x21   :  { %48 = dma.hbm_to_vmem [thread:$0]  %s569_s3, 2048, %s43_s28, [#allocation6], %s477_s21, %s477_s21, %s478_s22  }
  0x22   :  { %470 = dma.done.wait [#allocation3], 128  }
  0x23   :  { %471 = vsyncadd [#allocation3], 4294967168 }
  0x24   :  { %472 = dma.done.wait [#allocation6], 4096  }
  0x25   :  { %473 = vsyncadd [#allocation6], 4294963200  ;;  %v481_v0 = vmov 0.0   ;;  %vm482_vm0 = vmmov 0   ;;  %v76_v1 = vld [vmem:[#allocation5 + $0x78] sm:$0xff]  ;;  %v75_v2 = vld [vmem:[#allocation5 + $0x70] sm:$0xff] }
  0x26   :  { %308 = vmatprep.subr.mxu0 %v481_v0  ;;  %340 = vmatprep.mubr.msk.f32.mxu0 %vm482_vm0, %v481_v0  ;;  %v74_v3 = vld [vmem:[#allocation5 + $0x68] sm:$0xff]  ;;  %v73_v4 = vld [vmem:[#allocation5 + $0x60] sm:$0xff]  ;;  %v72_v5 = vld [vmem:[#allocation5 + $0x58] sm:$0xff]  ;;  %s483_s11 = smov [#allocation8]  }
  0x27   :  { %343 = vmatprep.subr.mxu1 %v481_v0  ;;  %375 = vmatprep.mubr.msk.f32.mxu1 %vm482_vm0, %v481_v0  ;;  %v71_v6 = vld [vmem:[#allocation5 + $0x50] sm:$0xff]  ;;  %v70_v7 = vld [vmem:[#allocation5 + $0x48] sm:$0xff]  ;;  %v69_v8 = vld [vmem:[#allocation5 + $0x40] sm:$0xff]  ;;  %s261_s12 = sshll.u32 %s483_s11, 4  ;;  %s262_s12 = int_to_ptr.vmem [resolvable:$true] %s261_s12 }
  0x28   :  { %309 = vmatpush3.msra.mxu0 %v76_v1  ;;  %v68_v9 = vld [vmem:[#allocation5 + $0x38] sm:$0xff]  ;;  %v67_v10 = vld [vmem:[#allocation5 + $0x30] sm:$0xff]  ;;  %v66_v11 = vld [vmem:[#allocation5 + $0x28] sm:$0xff]  ;;  %p455_p2 = scmp.lt.s32.totalorder %s262_s12, %s262_s12 }
  0x29   :  { %310 = vmatprep.subr.mxu0 %v481_v0  ;;  %v65_v12 = vld [vmem:[#allocation5 + $0x20] sm:$0xff]  ;;  %v64_v13 = vld [vmem:[#allocation5 + $0x18] sm:$0xff]  ;;  %v63_v14 = vld [vmem:[#allocation5 + $0x10] sm:$0xff] }
  0x2a   :  { %311 = vmatpush3.msra.mxu0 %v75_v2  ;;  %v62_v15 = vld [vmem:[#allocation5 + $0x8] sm:$0xff]  ;;  %v61_v16 = vld [vmem:[#allocation5] sm:$0xff]  ;;  %v60_v17 = vld [vmem:[#allocation2] sm:$0xff] }
  0x2b   :  { %312 = vmatprep.subr.mxu0 %v481_v0  ;;  %v176_v18 = vld [vmem:[#allocation7 + $0x78] sm:$0xff]  ;;  %v175_v19 = vld [vmem:[#allocation7 + $0x70] sm:$0xff]  ;;  %v174_v20 = vld [vmem:[#allocation7 + $0x68] sm:$0xff] }
  0x2c   :  { %313 = vmatpush3.msra.mxu0 %v74_v3  ;;  %344 = vmatpush3.msra.mxu1 %v176_v18  ;;  %v173_v21 = vld [vmem:[#allocation7 + $0x60] sm:$0xff]  ;;  %v172_v22 = vld [vmem:[#allocation7 + $0x58] sm:$0xff]  ;;  %v171_v23 = vld [vmem:[#allocation7 + $0x50] sm:$0xff] }
  0x2d   :  { %314 = vmatprep.subr.mxu0 %v481_v0  ;;  %345 = vmatprep.subr.mxu1 %v481_v0  ;;  %v170_v24 = vld [vmem:[#allocation7 + $0x48] sm:$0xff]  ;;  %v169_v25 = vld [vmem:[#allocation7 + $0x40] sm:$0xff]  ;;  %v168_v26 = vld [vmem:[#allocation7 + $0x38] sm:$0xff] }
  0x2e   :  { %315 = vmatpush3.msra.mxu0 %v73_v4  ;;  %346 = vmatpush3.msra.mxu1 %v175_v19  ;;  %v167_v27 = vld [vmem:[#allocation7 + $0x30] sm:$0xff]  ;;  %v166_v28 = vld [vmem:[#allocation7 + $0x28] sm:$0xff]  ;;  %v165_v29 = vld [vmem:[#allocation7 + $0x20] sm:$0xff] }
  0x2f   :  { %316 = vmatprep.subr.mxu0 %v481_v0  ;;  %347 = vmatprep.subr.mxu1 %v481_v0  ;;  %v164_v30 = vld [vmem:[#allocation7 + $0x18] sm:$0xff]  ;;  %v163_v31 = vld [vmem:[#allocation7 + $0x10] sm:$0xff]  ;;  %v162_v32 = vld [vmem:[#allocation7 + $0x8] sm:$0xff] }
  0x30   :  { %317 = vmatpush3.msra.mxu0 %v72_v5  ;;  %348 = vmatpush3.msra.mxu1 %v174_v20  ;;  %v161_v33 = vld [vmem:[#allocation7] sm:$0xff]  ;;  %v271_v34 = vld [vmem:[%s568_s2] ss:$0 sm:$0xff]  ;;  %s450_s2 = scalar_lea.vmem %s262_s12, 128 }
  0x31   :  { %318 = vmatprep.subr.mxu0 %v481_v0  ;;  %349 = vmatprep.subr.mxu1 %v481_v0  ;;  %v273_v43 = vld [vmem:[%s570_s4] ss:$0 sm:$0xff]  ;;  %p451_p1 = scmp.ne.s32.totalorder %s262_s12, %s450_s2  ;;  %p456_p3 = scmp.lt.s32.totalorder %s450_s2, %s450_s2 }
  0x32   :  { %319 = vmatpush3.msra.mxu0 %v71_v6  ;;  %350 = vmatpush3.msra.mxu1 %v173_v21 }
  0x33   :  { %320 = vmatprep.subr.mxu0 %v481_v0  ;;  %351 = vmatprep.subr.mxu1 %v481_v0  ;;  %p457_p4 = por %p456_p3, %p455_p2 }
  0x34   :  { %321 = vmatpush3.msra.mxu0 %v70_v7  ;;  %352 = vmatpush3.msra.mxu1 %v172_v22 }
  0x35   :  { %322 = vmatprep.subr.mxu0 %v481_v0  ;;  %353 = vmatprep.subr.mxu1 %v481_v0  ;;  %p458_p5 = pnand %p457_p4, %p451_p1 }
  0x36   :  { %323 = vmatpush3.msra.mxu0 %v69_v8  ;;  %354 = vmatpush3.msra.mxu1 %v171_v23 }
  0x37   :  { %324 = vmatprep.subr.mxu0 %v481_v0  ;;  %355 = vmatprep.subr.mxu1 %v481_v0 }
  0x38   :  { %325 = vmatpush3.msra.mxu0 %v68_v9  ;;  %356 = vmatpush3.msra.mxu1 %v170_v24 }
  0x39   :  { %326 = vmatprep.subr.mxu0 %v481_v0  ;;  %357 = vmatprep.subr.mxu1 %v481_v0 }
  0x3a   :  { %327 = vmatpush3.msra.mxu0 %v67_v10  ;;  %358 = vmatpush3.msra.mxu1 %v169_v25 }
  0x3b   :  { %328 = vmatprep.subr.mxu0 %v481_v0  ;;  %359 = vmatprep.subr.mxu1 %v481_v0 }
  0x3c   :  { %329 = vmatpush3.msra.mxu0 %v66_v11  ;;  %360 = vmatpush3.msra.mxu1 %v168_v26 }
  0x3d   :  { %330 = vmatprep.subr.mxu0 %v481_v0  ;;  %361 = vmatprep.subr.mxu1 %v481_v0 }
  0x3e   :  { %331 = vmatpush3.msra.mxu0 %v65_v12  ;;  %362 = vmatpush3.msra.mxu1 %v167_v27 }
  0x3f   :  { %332 = vmatprep.subr.mxu0 %v481_v0  ;;  %363 = vmatprep.subr.mxu1 %v481_v0 }
  0x40   :  { %333 = vmatpush3.msra.mxu0 %v64_v13  ;;  %364 = vmatpush3.msra.mxu1 %v166_v28 }
  0x41   :  { %334 = vmatprep.subr.mxu0 %v481_v0  ;;  %365 = vmatprep.subr.mxu1 %v481_v0 }
  0x42   :  { %335 = vmatpush3.msra.mxu0 %v63_v14  ;;  %366 = vmatpush3.msra.mxu1 %v165_v29 }
  0x43   :  { %336 = vmatprep.subr.mxu0 %v481_v0  ;;  %367 = vmatprep.subr.mxu1 %v481_v0 }
  0x44   :  { %337 = vmatpush3.msra.mxu0 %v62_v15  ;;  %368 = vmatpush3.msra.mxu1 %v164_v30 }
  0x45   :  { %338 = vmatprep.subr.mxu0 %v481_v0  ;;  %369 = vmatprep.subr.mxu1 %v481_v0 }
  0x46   :  { %339 = vmatpush3.msra.mxu0 %v61_v16  ;;  %370 = vmatpush3.msra.mxu1 %v163_v31 }
  0x47   :  { %341 = vmatmul.mubr.f32.vlgmr.msra.gmra.mxu0 %v60_v17  ;;  %371 = vmatprep.subr.mxu1 %v481_v0 }
  0x48   :  { %372 = vmatpush3.msra.mxu1 %v162_v32 }
  0x49   :  { %373 = vmatprep.subr.mxu1 %v481_v0 }
  0x4a   :  { %374 = vmatpush3.msra.mxu1 %v161_v33 }
 0x107   :  { %v150_v35 = vpop.f32.mrf.mxu0 }
 0x108   :  { %v151_v36 = vadd.f32 %v271_v34, %v150_v35 }
 0x109   :  { %v342_v37 = vpop.f32.mrf.mxu0 }
 0x10a   :  { %v272_v38 = vmul.f32 -1.442695, %v151_v36 }
 0x10c   :  { %386 = vpow2.f32 %v272_v38 }
 0x119   :  { %v387_v39 = vpop.eup %386 }
 0x11a   :  { %v157_v40 = vadd.f32 1.0, %v387_v39 }
 0x11c   :  { %388 = vrcp.f32 %v157_v40 }
 0x129   :  { %v389_v41 = vpop.eup %388 }
 0x12a   :  { %v160_v42 = vmul.f32 %v389_v41, %v151_v36 }
 0x12c   :  { %376 = vmatmul.mubr.f32.vlgmr.msra.gmra.mxu1 %v160_v42 }
 0x1ec   :  { %v250_v44 = vpop.f32.mrf.mxu1 }
 0x1ed   :  { %v251_v45 = vadd.f32 %v273_v43, %v250_v44 }
 0x1ee   :  { %v377_v46 = vpop.f32.mrf.mxu1 }
 0x1ef   :  { %254 = vst [vmem:[#allocation8] sm:$0xff] %v251_v45 }
 0x1f0   :  { %461 = shalt.err (!%p458_p5)
}
 0x1f1   :  { %264 = dma.vmem_to_hbm [thread:$0]  %s262_s12, 128, %s571_s5, [#allocation4]  }
 0x1f2   :  { %474 = dma.done.wait [#allocation4], 128  }
 0x1f3   :  { %475 = vsyncadd [#allocation4], 4294967168 }
 0x1f4   :  { %268 = vsyncpa [#allocation3], 1 }
 0x1f5   :  { %269 = vsyncpa [#allocation6], 1 }
 0x1f6   :  { %270 = vsyncpa [#allocation4], 1 }

</bundles_post_ra>
